<compile_context>
chip_gen: v5e
topology: v5e:2x2
jax: 0.10.0
libtpu: 0.0.40
codegen_flags: <defaults>
</compile_context>

<pallas_src>
import functools

import jax
import jax.numpy as jnp
import numpy as np
from jax.experimental import pallas as pl
from jax.experimental.pallas import tpu as pltpu


# ----------------------------------------------------------------------------
# Kernel 1: time-blocked conv (dense sub-band matmuls) + fused per-tile BN stats
# ----------------------------------------------------------------------------
def _conv_stats_kernel(x_ref, w_ref, o_ref, sum_ref, ssq_ref, *,
                       n_tblk, t_blk, win, stride, c_in, c_out):
    """x_ref: (TM, H_slab*C_in); w_ref: (WIN*C_in, T_BLK*C_out) dense sub-band;
    o_ref: (TM, H_out_pad*C_out); sum_ref/ssq_ref: (1, 1, H_out_pad*C_out)."""
    sums = []
    ssqs = []
    for tb in range(n_tblk):                       # static, unrolled
        in_lo = tb * t_blk * stride * c_in
        out_lo = tb * t_blk * c_out
        xs = x_ref[:, in_lo:in_lo + win * c_in]
        acc = jnp.dot(xs, w_ref[...], preferred_element_type=jnp.float32)
        o_ref[:, out_lo:out_lo + t_blk * c_out] = acc.astype(o_ref.dtype)
        # per-(time,channel) partial statistics: pure sublane reductions
        sums.append(jnp.sum(acc, axis=0, keepdims=True))
        ssqs.append(jnp.sum(acc * acc, axis=0, keepdims=True))
    sum_ref[...] = jnp.concatenate(sums, axis=-1).reshape(sum_ref.shape)
    ssq_ref[...] = jnp.concatenate(ssqs, axis=-1).reshape(ssq_ref.shape)


# ----------------------------------------------------------------------------
# Kernel 2: tiled BN normalize (+ optional fused residual add / ReLU epilogue)
# ----------------------------------------------------------------------------
def _bn_apply_kernel(*refs, relu, has_res):
    if has_res:
        y_ref, scale_ref, shift_ref, res_ref, o_ref = refs
    else:
        y_ref, scale_ref, shift_ref, o_ref = refs
        res_ref = None
    y = y_ref[...].astype(jnp.float32)
    out = y * scale_ref[...] + shift_ref[...]
    if has_res:
        out = out + res_ref[...].astype(jnp.float32)
    if relu:
        out = jnp.maximum(out, 0.0)
    o_ref[...] = out.astype(o_ref.dtype)


# ----------------------------------------------------------------------------
# Helpers
# ----------------------------------------------------------------------------
def _round_up(x, m):
    return (x + m - 1) // m * m


def _cdiv(a, b):
    return -(-a // b)


def _vmem_limit_bytes():
    """Generation-aware scoped VMEM limit (~96 MiB on v5e/v6e, ~48 MiB on v7x)."""
    cap = 64 * 1024 * 1024  # conservative fallback (v7x per-TC)
    try:
        info = pltpu.get_tpu_info()
        cap = int(getattr(info, "vmem_capacity_bytes", cap))
    except Exception:
        pass
    return min((cap * 3) // 4, 100 * 1024 * 1024)


def _pick_tm(m, bytes_per_row, budget_bytes, *, cap=512):
    """Largest row tile whose double-buffered tiles fit the budget, kept small
    enough that the parallel grid has >= 2 steps (both v7x TensorCores busy)."""
    tm = min(cap, max(8, budget_bytes // max(bytes_per_row, 1)))
    tm -= tm % 8
    tm = max(tm, 8)
    if m > 8:
        tm = min(tm, max(8, _round_up((m + 1) // 2, 8)))
    return int(min(tm, _round_up(m, 8)))


# ----------------------------------------------------------------------------
# Wrapper
# ----------------------------------------------------------------------------
def temporal_conv_bn(x, w, b, gamma, beta, *, stride=1, dilation=1, eps=1e-5,
                     compute_dtype=None, tm=None, t_blk=None,
                     residual=None, relu=False):
    """unit_tcn forward: Conv2d((k,1), stride=(s,1), pad=((k-1)//2, 0)) followed
    by BatchNorm2d with training-mode batch statistics.  Optionally fuses the
    TCN_GCN_unit tail (residual add + ReLU) into the normalize pass.

    x: (N, C_in, H, W) NCHW; w: (C_out, C_in, k, 1); b/gamma/beta: (C_out,).
    `b` is accepted for API parity but unused: training-mode BN subtracts the
    batch mean immediately afterwards, so the conv bias cancels exactly.
    residual (optional): (N, C_out, H_out, W).
    """
    del b  # cancels under training-mode BN (batch statistics)
    N, C_in, H, W = x.shape
    C_out, _, k, _ = w.shape
    pad = (k + (k - 1) * (dilation - 1) - 1) // 2
    H_out = (H + 2 * pad - dilation * (k - 1) - 1) // stride + 1
    H_pad = H + 2 * pad

    cdt = x.dtype if compute_dtype is None else jnp.dtype(compute_dtype)
    el_b = jnp.dtype(cdt).itemsize
    out_dtype = x.dtype

    # --- time blocking -------------------------------------------------------
    if t_blk is None:
        # >=128 output lanes per block when possible (unmasked stores), small
        # enough that the dense sub-band weight stays close to the real FLOPs.
        t_blk = min(H_out, max(4, _cdiv(128, C_out)))
    t_blk = max(1, min(int(t_blk), H_out))
    n_tblk = _cdiv(H_out, t_blk)
    H_out_pad = n_tblk * t_blk
    win = (t_blk - 1) * stride + (k - 1) * dilation + 1
    H_slab = max(H_pad, (H_out_pad - 1) * stride + (k - 1) * dilation + 1)
    IN_L = H_slab * C_in
    OUT_L = H_out_pad * C_out

    # --- NCHW -> lane-dense row slab (M, H_slab*C_in), M = N*W ---------------
    M = N * W
    x_t = jnp.transpose(x, (0, 3, 2, 1)).reshape(M, H, C_in)
    x_t = jnp.pad(x_t, ((0, 0), (pad, H_slab - H - pad), (0, 0)))
    x_slab = x_t.reshape(M, IN_L).astype(cdt)

    # --- small dense sub-band weight, identical for every time block --------
    # W_sub[(tl*stride + j*dil)*C_in + ci, tl*C_out + co] = w[co, ci, j]
    w_taps = jnp.transpose(w[:, :, :, 0], (2, 1, 0)).astype(jnp.float32)  # (k,Ci,Co)
    tl = np.arange(t_blk)[:, None, None, None]
    jj = np.arange(k)[None, :, None, None]
    ci = np.arange(C_in)[None, None, :, None]
    co = np.arange(C_out)[None, None, None, :]
    rows = np.broadcast_to((tl * stride + jj * dilation) * C_in + ci,
                           (t_blk, k, C_in, C_out)).reshape(-1)
    cols = np.broadcast_to(tl * C_out + co, (t_blk, k, C_in, C_out)).reshape(-1)
    vals = jnp.broadcast_to(w_taps[None], (t_blk, k, C_in, C_out)).reshape(-1)
    w_sub = (jnp.zeros((win * C_in, t_blk * C_out), jnp.float32)
             .at[rows, cols].set(vals).astype(cdt))

    # --- generation-aware VMEM budget + row tiling ---------------------------
    vmem_limit = _vmem_limit_bytes()
    w_bytes = win * C_in * t_blk * C_out * el_b
    stats_bytes = 2 * 2 * OUT_L * 4
    per_row = 2 * IN_L * el_b + 2 * OUT_L * el_b       # double-buffered in/out
    budget = max(1 << 20, (vmem_limit * 2) // 3 - 2 * w_bytes - stats_bytes)
    if tm is None:
        tm = _pick_tm(M, per_row, budget)
    tm = max(8, int(tm) - int(tm) % 8)
    m_pad = _round_up(M, tm)
    if m_pad != M:
        # Zero rows produce zero conv outputs (no bias), so they contribute
        # nothing to the statistics.
        x_slab = jnp.pad(x_slab, ((0, m_pad - M), (0, 0)))
    grid = (m_pad // tm,)
    grid_m = grid[0]

    cparams = pltpu.CompilerParams(
        dimension_semantics=("parallel",),
        vmem_limit_bytes=int(vmem_limit))

    conv_kernel = functools.partial(
        _conv_stats_kernel, n_tblk=n_tblk, t_blk=t_blk, win=win,
        stride=stride, c_in=C_in, c_out=C_out)

    def run_conv(single_buffer_w):
        w_kwargs = {}
        if single_buffer_w:
            # grid-invariant operand -> a second pipeline buffer buys nothing
            w_kwargs["pipeline_mode"] = pl.Buffered(1)
        w_spec = pl.BlockSpec((win * C_in, t_blk * C_out), lambda i: (0, 0),
                              **w_kwargs)
        # TODO(synk): optionally pl.Buffered(3) on x_slab once TM is large.
        return pl.pallas_call(
            conv_kernel,
            out_shape=(
                jax.ShapeDtypeStruct((m_pad, OUT_L), cdt),
                jax.ShapeDtypeStruct((grid_m, 1, OUT_L), jnp.float32),
                jax.ShapeDtypeStruct((grid_m, 1, OUT_L), jnp.float32),
            ),
            grid_spec=pltpu.PrefetchScalarGridSpec(
                num_scalar_prefetch=0,
                grid=grid,
                in_specs=[
                    pl.BlockSpec((tm, IN_L), lambda i: (i, 0)),
                    w_spec,
                ],
                out_specs=[
                    pl.BlockSpec((tm, OUT_L), lambda i: (i, 0)),
                    pl.BlockSpec((1, 1, OUT_L), lambda i: (i, 0, 0)),
                    pl.BlockSpec((1, 1, OUT_L), lambda i: (i, 0, 0)),
                ],
            ),
            compiler_params=cparams,
        )(x_slab, w_sub)

    try:
        conv_out, tile_sum, tile_ssq = run_conv(True)
    except Exception:
        # pipeline_mode=pl.Buffered(1) unsupported on this JAX: fall back; the
        # sub-band weight is small so double-buffering it is still cheap.
        conv_out, tile_sum, tile_ssq = run_conv(False)

    # --- reduce tiny per-tile statistics; fold BN into a per-channel affine --
    # Padded output-time columns (t >= H_out) are simply excluded here, so any
    # values they hold never influence the batch statistics.
    lane_sum = jnp.sum(tile_sum, axis=(0, 1)).reshape(H_out_pad, C_out)[:H_out]
    lane_ssq = jnp.sum(tile_ssq, axis=(0, 1)).reshape(H_out_pad, C_out)[:H_out]
    count = float(M * H_out)
    mean = jnp.sum(lane_sum, axis=0) / count                      # (C_out,)
    var = jnp.sum(lane_ssq, axis=0) / count - mean * mean         # biased (BN)
    # One-pass E[x^2]-E[x]^2 can cancel for strongly un-centered outputs.
    # TODO(synk): switch to a shifted / Welford-style tile reduction if needed.
    var = jnp.maximum(var, 0.0)
    inv = jax.lax.rsqrt(var + eps)
    scale = gamma.astype(jnp.float32) * inv
    shift = beta.astype(jnp.float32) - mean * scale
    scale_slab = jnp.tile(scale, (H_out_pad,)).reshape(1, OUT_L)  # lane t*C+c
    shift_slab = jnp.tile(shift, (H_out_pad,)).reshape(1, OUT_L)

    # --- tiled normalize (+ optional residual/ReLU), aliased in place --------
    has_res = residual is not None
    inputs = [conv_out, scale_slab, shift_slab]
    in_specs = [
        pl.BlockSpec((tm, OUT_L), lambda i: (i, 0)),
        pl.BlockSpec((1, OUT_L), lambda i: (0, 0)),
        pl.BlockSpec((1, OUT_L), lambda i: (0, 0)),
    ]
    if has_res:
        r = jnp.transpose(residual, (0, 3, 2, 1)).reshape(M, H_out, C_out)
        r = jnp.pad(r, ((0, m_pad - M), (0, H_out_pad - H_out), (0, 0)))
        inputs.append(r.reshape(m_pad, OUT_L).astype(out_dtype))
        in_specs.append(pl.BlockSpec((tm, OUT_L), lambda i: (i, 0)))

    io_alias = {0: 0} if conv_out.dtype == out_dtype else {}
    bn_out = pl.pallas_call(
        functools.partial(_bn_apply_kernel, relu=relu, has_res=has_res),
        out_shape=jax.ShapeDtypeStruct((m_pad, OUT_L), out_dtype),
        grid_spec=pltpu.PrefetchScalarGridSpec(
            num_scalar_prefetch=0,
            grid=grid,
            in_specs=in_specs,
            out_specs=pl.BlockSpec((tm, OUT_L), lambda i: (i, 0)),
        ),
        compiler_params=cparams,
        input_output_aliases=io_alias,
    )(*inputs)

    # --- lane-dense slab -> NCHW ---------------------------------------------
    y = bn_out[:M].reshape(N, W, H_out_pad, C_out)[:, :, :H_out, :]
    return jnp.transpose(y, (0, 3, 2, 1))


# ----------------------------------------------------------------------------
# Reference (plain JAX) for verification
# ----------------------------------------------------------------------------
def reference(x, w, b, gamma, beta, *, stride=1, dilation=1, eps=1e-5):
    C_out = w.shape[0]
    k = w.shape[2]
    pad = (k + (k - 1) * (dilation - 1) - 1) // 2
    y = jax.lax.conv_general_dilated(
        x, w, window_strides=(stride, 1), padding=((pad, pad), (0, 0)),
        rhs_dilation=(dilation, 1),
        dimension_numbers=("NCHW", "OIHW", "NCHW"),
        precision=jax.lax.Precision.HIGHEST)
    y = y + b.reshape(1, C_out, 1, 1)
    mean = jnp.mean(y, axis=(0, 2, 3), keepdims=True)
    var = jnp.mean((y - mean) ** 2, axis=(0, 2, 3), keepdims=True)
    return (y - mean) * jax.lax.rsqrt(var + eps) * gamma.reshape(1, C_out, 1, 1) \
           + beta.reshape(1, C_out, 1, 1)


if __name__ == "__main__":
    # Small shapes consistent with the module: N=2, C_in=4, C_out=8, H=16, W=16, k=3
    N, C_in, C_out, H, W = 2, 4, 8, 16, 16
    k = 3

    key = jax.random.PRNGKey(0)
    kx, kw, kb, kg, kbt, kr = jax.random.split(key, 6)

    x = jax.random.normal(kx, (N, C_in, H, W), jnp.float32)
    fan_in = C_in * k
    bound = 1.0 / np.sqrt(fan_in)
    w = jax.random.uniform(kw, (C_out, C_in, k, 1), jnp.float32,
                           minval=-bound, maxval=bound)
    b = jax.random.uniform(kb, (C_out,), jnp.float32, minval=-bound, maxval=bound)
    gamma = jax.random.uniform(kg, (C_out,), jnp.float32, minval=0.5, maxval=1.5)
    beta = jax.random.uniform(kbt, (C_out,), jnp.float32, minval=-0.5, maxval=0.5)

    # 1) f32 path, auto row/time tiling, stride 1 — tight tolerance.
    out = jax.block_until_ready(
        temporal_conv_bn(x, w, b, gamma, beta, stride=1, dilation=1))
    ref = reference(x, w, b, gamma, beta, stride=1, dilation=1)
    assert out.shape == ref.shape, (out.shape, ref.shape)
    np.testing.assert_allclose(np.asarray(out), np.asarray(ref),
                               rtol=5e-3, atol=5e-3)

    # 2) bf16 MXU path, stride 2, forced small row tile + 2 time blocks —
    #    exercises the multi-tile / multi-block statistics reduction.
    out2 = jax.block_until_ready(
        temporal_conv_bn(x, w, b, gamma, beta, stride=2, dilation=1,
                         compute_dtype=jnp.bfloat16, tm=8, t_blk=4))
    ref2 = reference(x, w, b, gamma, beta, stride=2, dilation=1)
    assert out2.shape == ref2.shape, (out2.shape, ref2.shape)
    np.testing.assert_allclose(np.asarray(out2), np.asarray(ref2),
                               rtol=6e-2, atol=6e-2)

    # 3) fused residual + ReLU epilogue (TCN_GCN_unit tail), f32, t_blk=6 —
    #    also exercises padded output-time columns (H_out_pad > H_out) being
    #    excluded from the batch statistics and sliced from the output.
    res = jax.random.normal(kr, (N, C_out, H, W), jnp.float32)
    out3 = jax.block_until_ready(
        temporal_conv_bn(x, w, b, gamma, beta, stride=1, dilation=1,
                         t_blk=6, residual=res, relu=True))
    ref3 = jnp.maximum(reference(x, w, b, gamma, beta, stride=1) + res, 0.0)
    assert out3.shape == ref3.shape, (out3.shape, ref3.shape)
    np.testing.assert_allclose(np.asarray(out3), np.asarray(ref3),
                               rtol=5e-3, atol=5e-3)

    print("KERNEL_OK")
</pallas_src>

<mosaic_0001>
module attributes {stable_mosaic.version = 11 : i64} {
  func.func @_conv_stats_kernel(%arg0: i32, %arg1: memref<16x72xf32, #tpu.memory_space<vmem>>, %arg2: memref<72x128xf32, #tpu.memory_space<vmem>>, %arg3: memref<16x128xf32, #tpu.memory_space<vmem>>, %arg4: memref<1x1x128xf32, #tpu.memory_space<vmem>>, %arg5: memref<1x1x128xf32, #tpu.memory_space<vmem>>) attributes {dimension_semantics = [#tpu.dimension_semantics<parallel>], iteration_bounds = array<i64: 2>, scalar_prefetch = 0 : i64, scratch_operands = 0 : i64, tpu.core_type = #tpu.core_type<tc>, window_params = [{transform_indices = @transform_0, window_bounds = array<i64: 16, 72>}, {pipeline_mode = #tpu.pipeline_mode<synchronous>, transform_indices = @transform_1, window_bounds = array<i64: 72, 128>}, {transform_indices = @transform_2, window_bounds = array<i64: 16, 128>}, {transform_indices = @transform_3, window_bounds = array<i64: 1, 1, 128>}, {transform_indices = @transform_4, window_bounds = array<i64: 1, 1, 128>}]} {
    %c0 = arith.constant 0 : index
    %c0_0 = arith.constant 0 : index
    %0 = vector.load %arg1[%c0, %c0_0] : memref<16x72xf32, #tpu.memory_space<vmem>>, vector<16x72xf32>
    %c0_1 = arith.constant 0 : index
    %c0_2 = arith.constant 0 : index
    %1 = vector.load %arg2[%c0_1, %c0_2] : memref<72x128xf32, #tpu.memory_space<vmem>>, vector<72x128xf32>
    %cst = arith.constant dense<0.000000e+00> : vector<16x128xf32>
    %2 = tpu.matmul %0, %1, %cst {dimension_numbers = #tpu.dot_dimension_numbers<[1], [0], [0], [1], [0, 0, 1, 1], [], []>} : vector<16x72xf32>, vector<72x128xf32>, vector<16x128xf32> -> vector<16x128xf32>
    %c0_3 = arith.constant 0 : index
    %c0_4 = arith.constant 0 : index
    %3 = vector.load %arg3[%c0_3, %c0_4] : memref<16x128xf32, #tpu.memory_space<vmem>>, vector<16x128xf32>
    tpu.vector_store %arg3[%c0_3, %c0_4], %2 {strides = array<i32>} : memref<16x128xf32, #tpu.memory_space<vmem>>, vector<16x128xf32>,
    %cst_5 = arith.constant dense<0.000000e+00> : vector<128xf32>
    %4 = vector.multi_reduction <add>, %2, %cst_5 [0] : vector<16x128xf32> to vector<128xf32>
    %5 = vector.shape_cast %4 : vector<128xf32> to vector<1x128xf32>
    %6 = arith.mulf %2, %2 : vector<16x128xf32>
    %cst_6 = arith.constant dense<0.000000e+00> : vector<128xf32>
    %7 = vector.multi_reduction <add>, %6, %cst_6 [0] : vector<16x128xf32> to vector<128xf32>
    %8 = vector.shape_cast %7 : vector<128xf32> to vector<1x128xf32>
    %9 = vector.shape_cast %5 : vector<1x128xf32> to vector<1x1x128xf32>
    %c0_7 = arith.constant 0 : index
    %c0_8 = arith.constant 0 : index
    %c0_9 = arith.constant 0 : index
    %10 = vector.load %arg4[%c0_7, %c0_8, %c0_9] : memref<1x1x128xf32, #tpu.memory_space<vmem>>, vector<1x1x128xf32>
    tpu.vector_store %arg4[%c0_7, %c0_8, %c0_9], %9 {strides = array<i32>} : memref<1x1x128xf32, #tpu.memory_space<vmem>>, vector<1x1x128xf32>,
    %11 = vector.shape_cast %8 : vector<1x128xf32> to vector<1x1x128xf32>
    %c0_10 = arith.constant 0 : index
    %c0_11 = arith.constant 0 : index
    %c0_12 = arith.constant 0 : index
    %12 = vector.load %arg5[%c0_10, %c0_11, %c0_12] : memref<1x1x128xf32, #tpu.memory_space<vmem>>, vector<1x1x128xf32>
    tpu.vector_store %arg5[%c0_10, %c0_11, %c0_12], %11 {strides = array<i32>} : memref<1x1x128xf32, #tpu.memory_space<vmem>>, vector<1x1x128xf32>,
    return
  }
  func.func @transform_0(%arg0: i32) -> (i32, i32) {
    %c0_i32 = arith.constant 0 : i32
    %c0_i32_0 = arith.constant 0 : i32
    return %arg0, %c0_i32 : i32, i32
  }
  func.func @transform_1(%arg0: i32) -> (i32, i32) {
    %c0_i32 = arith.constant 0 : i32
    %c0_i32_0 = arith.constant 0 : i32
    %c0_i32_1 = arith.constant 0 : i32
    return %c0_i32, %c0_i32_0 : i32, i32
  }
  func.func @transform_2(%arg0: i32) -> (i32, i32) {
    %c0_i32 = arith.constant 0 : i32
    %c0_i32_0 = arith.constant 0 : i32
    return %arg0, %c0_i32 : i32, i32
  }
  func.func @transform_3(%arg0: i32) -> (i32, i32, i32) {
    %c0_i32 = arith.constant 0 : i32
    %c0_i32_0 = arith.constant 0 : i32
    %c0_i32_1 = arith.constant 0 : i32
    return %arg0, %c0_i32, %c0_i32_0 : i32, i32, i32
  }
  func.func @transform_4(%arg0: i32) -> (i32, i32, i32) {
    %c0_i32 = arith.constant 0 : i32
    %c0_i32_0 = arith.constant 0 : i32
    %c0_i32_1 = arith.constant 0 : i32
    return %arg0, %c0_i32, %c0_i32_0 : i32, i32, i32
  }
}

module attributes {stable_mosaic.version = 11 : i64} {
  func.func @_conv_stats_kernel(%arg0: i32, %arg1: memref<16x72xf32, #tpu.memory_space<vmem>>, %arg2: memref<72x128xf32, #tpu.memory_space<vmem>>, %arg3: memref<16x128xf32, #tpu.memory_space<vmem>>, %arg4: memref<1x1x128xf32, #tpu.memory_space<vmem>>, %arg5: memref<1x1x128xf32, #tpu.memory_space<vmem>>) attributes {dimension_semantics = [#tpu.dimension_semantics<parallel>], iteration_bounds = array<i64: 2>, scalar_prefetch = 0 : i64, scratch_operands = 0 : i64, tpu.core_type = #tpu.core_type<tc>, window_params = [{transform_indices = @transform_0, window_bounds = array<i64: 16, 72>}, {pipeline_mode = #tpu.pipeline_mode<synchronous>, transform_indices = @transform_1, window_bounds = array<i64: 72, 128>}, {transform_indices = @transform_2, window_bounds = array<i64: 16, 128>}, {transform_indices = @transform_3, window_bounds = array<i64: 1, 1, 128>}, {transform_indices = @transform_4, window_bounds = array<i64: 1, 1, 128>}]} {
    %c0 = arith.constant 0 : index
    %c0_0 = arith.constant 0 : index
    %0 = vector.load %arg1[%c0, %c0_0] : memref<16x72xf32, #tpu.memory_space<vmem>>, vector<16x72xf32>
    %c0_1 = arith.constant 0 : index
    %c0_2 = arith.constant 0 : index
    %1 = vector.load %arg2[%c0_1, %c0_2] : memref<72x128xf32, #tpu.memory_space<vmem>>, vector<72x128xf32>
    %cst = arith.constant dense<0.000000e+00> : vector<16x128xf32>
    %2 = tpu.matmul %0, %1, %cst {dimension_numbers = #tpu.dot_dimension_numbers<[1], [0], [0], [1], [0, 0, 1, 1], [], []>} : vector<16x72xf32>, vector<72x128xf32>, vector<16x128xf32> -> vector<16x128xf32>
    %c0_3 = arith.constant 0 : index
    %c0_4 = arith.constant 0 : index
    %3 = vector.load %arg3[%c0_3, %c0_4] : memref<16x128xf32, #tpu.memory_space<vmem>>, vector<16x128xf32>
    tpu.vector_store %arg3[%c0_3, %c0_4], %2 {strides = array<i32>} : memref<16x128xf32, #tpu.memory_space<vmem>>, vector<16x128xf32>,
    %cst_5 = arith.constant dense<0.000000e+00> : vector<128xf32>
    %4 = vector.multi_reduction <add>, %2, %cst_5 [0] : vector<16x128xf32> to vector<128xf32>
    %5 = vector.shape_cast %4 : vector<128xf32> to vector<1x128xf32>
    %6 = arith.mulf %2, %2 : vector<16x128xf32>
    %cst_6 = arith.constant dense<0.000000e+00> : vector<128xf32>
    %7 = vector.multi_reduction <add>, %6, %cst_6 [0] : vector<16x128xf32> to vector<128xf32>
    %8 = vector.shape_cast %7 : vector<128xf32> to vector<1x128xf32>
    %9 = vector.shape_cast %5 : vector<1x128xf32> to vector<1x1x128xf32>
    %c0_7 = arith.constant 0 : index
    %c0_8 = arith.constant 0 : index
    %c0_9 = arith.constant 0 : index
    %10 = vector.load %arg4[%c0_7, %c0_8, %c0_9] : memref<1x1x128xf32, #tpu.memory_space<vmem>>, vector<1x1x128xf32>
    tpu.vector_store %arg4[%c0_7, %c0_8, %c0_9], %9 {strides = array<i32>} : memref<1x1x128xf32, #tpu.memory_space<vmem>>, vector<1x1x128xf32>,
    %11 = vector.shape_cast %8 : vector<1x128xf32> to vector<1x1x128xf32>
    %c0_10 = arith.constant 0 : index
    %c0_11 = arith.constant 0 : index
    %c0_12 = arith.constant 0 : index
    %12 = vector.load %arg5[%c0_10, %c0_11, %c0_12] : memref<1x1x128xf32, #tpu.memory_space<vmem>>, vector<1x1x128xf32>
    tpu.vector_store %arg5[%c0_10, %c0_11, %c0_12], %11 {strides = array<i32>} : memref<1x1x128xf32, #tpu.memory_space<vmem>>, vector<1x1x128xf32>,
    return
  }
  func.func @transform_0(%arg0: i32) -> (i32, i32) {
    %c0_i32 = arith.constant 0 : i32
    %c0_i32_0 = arith.constant 0 : i32
    return %arg0, %c0_i32 : i32, i32
  }
  func.func @transform_1(%arg0: i32) -> (i32, i32) {
    %c0_i32 = arith.constant 0 : i32
    %c0_i32_0 = arith.constant 0 : i32
    %c0_i32_1 = arith.constant 0 : i32
    return %c0_i32, %c0_i32_0 : i32, i32
  }
  func.func @transform_2(%arg0: i32) -> (i32, i32) {
    %c0_i32 = arith.constant 0 : i32
    %c0_i32_0 = arith.constant 0 : i32
    return %arg0, %c0_i32 : i32, i32
  }
  func.func @transform_3(%arg0: i32) -> (i32, i32, i32) {
    %c0_i32 = arith.constant 0 : i32
    %c0_i32_0 = arith.constant 0 : i32
    %c0_i32_1 = arith.constant 0 : i32
    return %arg0, %c0_i32, %c0_i32_0 : i32, i32, i32
  }
  func.func @transform_4(%arg0: i32) -> (i32, i32, i32) {
    %c0_i32 = arith.constant 0 : i32
    %c0_i32_0 = arith.constant 0 : i32
    %c0_i32_1 = arith.constant 0 : i32
    return %arg0, %c0_i32, %c0_i32_0 : i32, i32, i32
  }
}

</mosaic_0001>

<bundles_post_ra>
// kernel: tpu_custom_call.1
= control target key start
LH: loop header
LB: loop body
LE: loop exit
PB: predicated region body
PF: predicated region fallthrough
CT: control target
= control target key end

     0   :  { %10 = vsyncpa [#allocation3], 0  ;;  %s1030_s0 = inlined_call_operand.hbm [shape: f32[32,72], index: 0, kind: input, shape index: {}]   ;;  %s1031_s1 = inlined_call_operand.hbm [shape: f32[72,128], index: 1, kind: input, shape index: {}]   ;;  %s1032_s2 = inlined_call_operand.hbm [shape: f32[32,128], index: 2, kind: output, shape index: {0}]   ;;  %s1033_s3 = inlined_call_operand.hbm [shape: f32[2,1,128], index: 3, kind: output, shape index: {1}]   ;;  %s1034_s4 = inlined_call_operand.hbm [shape: f32[2,1,128], index: 4, kind: output, shape index: {2}]  }
   0x1   :  { %12 = vsyncpa [#allocation3 + $0x1], 0 }
   0x2   :  { %13 = vsyncpa [#allocation6], 0 }
   0x3   :  { %14 = vsyncpa [#allocation4], 0 }
   0x4   :  { %16 = vsyncpa [#allocation4 + $0x1], 0 }
   0x5   :  { %17 = vsyncpa [#allocation9], 0 }
   0x6   :  { %19 = vsyncpa [#allocation9 + $0x1], 0  ;;  %s822_s15 = smov 0   ;;  %s824_s16 = smov 0  }
   0x7   :  { %s826_s17 = smov 0   ;;  %s828_s18 = smov 0  }
   0x8 LB: > { %s843_s19 = sadd.s32 4294967295, %s790_s18   ;;  %s1035_s20 = sadd.s32 4294967294, %s790_s18   ;;  %s790_s18 = sphi %s828_s18, %s1046_s18   ;;  %s786_s17 = sphi %s826_s17, %s1045_s17   ;;  %s782_s16 = sphi %s824_s16, %s1044_s16   ;;  %s778_s15 = sphi %s822_s15, %s1043_s15  }
   0x9   : > { %p45_p0 = scmp.ne.s32.totalorder %s782_s16, %s778_s15  ;;  %p46_p1 = scmp.eq.s32.totalorder %s843_s19, 0 }
   0xa   : > { %p90_p2 = scmp.eq.s32.totalorder %s843_s19, 1  ;;  %p96_p3 = scmp.eq.s32.totalorder %s1035_s20, 1 }
   0xb   : > { %p854_p4 = por %p46_p1, %p45_p0  ;;  %p501_p5 = scmp.ge.s32.totalorder %s790_s18, 1 }
   0xc   : > { %p859_p6 = por %p96_p3, %p45_p0  ;;  %p155_p7 = scmp.lt.s32.totalorder %s790_s18, 3 }
   0xd   : > { %s166_s25 = sshll.u32 %s1031_s1, 4  ;;  %s792_s27 = smov [#allocation5]   ;;  %s167_s25 = int_to_ptr.hbm [resolvable:$true] %s166_s25 }
   0xe   : > { %p867_p8 = pnand %p501_p5, %p155_p7  ;;  %s168_s28 = sshll.u32 %s792_s27, 4  ;;  %s169_s28 = int_to_ptr.vmem [resolvable:$true] %s168_s28 }
   0xf   : > { %s877_s29 = sadd.s32 1, %s790_s18   ;;  %s793_s30 = smov 128  }
  0x10   : > { %p541_p9 = pneg %p867_p8  ;;  %s794_s5 = smov 8  }
  0x11   : > { %s29_s6 = ssub.s32 %s790_s18, %s877_s29  ;;  %s32_s7 = sadd.s32 1, %s786_s17 }
  0x12   : > { %p542_p10 = pnand %p541_p9, %p46_p1  ;;  %p30_p12 = scmp.eq.s32.totalorder %s29_s6, 0 }
  0x13   : > { %p39_p13 = scmp.ne.s32.totalorder %s786_s17, %s782_s16  ;;  %p40_p0 = scmp.eq.s32.totalorder %s790_s18, 0 }
  0x14   : > { %544 = dma.hbm_to_vmem [thread:$0]  (!%p542_p10), %s167_s25, 1152, %s169_s28, [#allocation6], %s793_s30, %s793_s30, %s794_s5  }
  0x15   : > { %s889_s8 = scalar_select %p30_p12, %s786_s17, %s32_s7  }
  0x16   : > { %p893_p3 = por %p90_p2, %p39_p13  ;;  %p560_p5 = scmp.lt.s32.totalorder %s790_s18, 2 }
  0x17   : > { %s182_s10 = sand.u32 1, %s786_s17   ;;  %s518_s11 = sshll.u32 %s790_s18, 4 }
  0x18   : > { %p41_p7 = por %p40_p0, %p39_p13  ;;  %s504_s12 = sshll.u32 %s182_s10, 4 }
  0x19   : > { %s191_s23 = scalar_lea.hbm %s1030_s0, %s518_s11  ;;  %s186_s25 = scalar_lea.vmem [#allocation2], %s504_s12 }
  0x1a   : > { %s192_s24 = sshll.u32 %s191_s23, 4  ;;  %s194_s27 = sshll.u32 %s186_s25, 4  ;;  %s193_s24 = int_to_ptr.hbm [resolvable:$true] %s192_s24  ;;  %s195_s27 = int_to_ptr.vmem [resolvable:$true] %s194_s27 }
  0x1b   : > { %p903_p9 = pnand %p560_p5, %p41_p7  ;;  %s183_s6 = scalar_lea.sflag [#allocation3], %s182_s10 }
  0x1c   : > { %s630_s7 = sshra.s32 %s193_s24, 4  ;;  %s637_s12 = scalar_lea.hbm %s1030_s0, 32  ;;  %s631_s7 = int_to_ptr.hbm [resolvable:$true] %s630_s7 }
  0x1d   : > { %s632_s20 = scalar_lea.hbm %s631_s7, 16  ;;  %p634_p10 = pneg %p903_p9 }
  0x1e   : > { %p633_p2 = scmp.ne.s32.totalorder %s631_s7, %s632_s20  ;;  %p638_p0 = scmp.lt.s32.totalorder %s631_s7, %s1030_s0 }
  0x1f   : > { %p639_p5 = scmp.lt.s32.totalorder %s637_s12, %s632_s20 }
  0x20   : > { %p635_p12 = pnand %p634_p10, %p633_p2 }
  0x21   : > { %p640_p7 = por %p639_p5, %p638_p0 }
  0x22   : > { %p636_p13 = pneg %p635_p12 }
  0x24   : > { %p641_p11 = pnand %p640_p7, %p636_p13 }
  0x26   : > { %644 = shalt.err (!%p641_p11)
}
  0x27   : > { %548 = dma.hbm_to_vmem [thread:$0]  (!%p903_p9), %s193_s24, 256, %s195_s27, %s183_s6, %s793_s30, %s793_s30, %s794_s5  }
  0x28   : > { %206 = sbr.rel (%p867_p8) target bundleno = 227 (0xe3), region = 28  ;;  %s923_s10 = sand.u32 (!%p867_p8), 1, %s782_s16  }
  0x29   : > { %s508_s20 = sshll.u32 (!%p867_p8), %s923_s10, 4  ;;  %s209_s25 = scalar_lea.sflag (!%p867_p8), [#allocation3], %s923_s10 }
  0x2a   : > { %s929_s7 = scalar_lea.vmem (!%p867_p8), [#allocation2], %s508_s20 }
  0x2d   : > { %761 = dma.done.wait (%p854_p4), %s209_s25, 256  }
  0x2e   : > { %763 = vsyncadd (%p854_p4), %s209_s25, 4294967040 }
  0x2f   : > { %765 = dma.done.wait (%p46_p1), [#allocation6], 1152  }
  0x30   : > { %767 = vsyncadd (%p46_p1), [#allocation6], 4294966144  ;;  %v263_v0 = vld [vmem:[#allocation5 + $0x40] sm:$0xff]  ;;  %v262_v1 = vld [vmem:[#allocation5 + $0x38] sm:$0xff]  ;;  %vm264_vm0 = vcmask 588800   ;;  %s519_s21 = sshll.u32 %s843_s19, 4 }
  0x31   : > { %278 = vmatpush.msra.mxu0 %v263_v0  ;;  %520 = vmatpush.msra.mxu1 %v263_v0  ;;  %v261_v2 = vld [vmem:[#allocation5 + $0x30] sm:$0xff]  ;;  %v260_v3 = vld [vmem:[#allocation5 + $0x28] sm:$0xff]  ;;  %v259_v4 = vld [vmem:[#allocation5 + $0x20] sm:$0xff]  ;;  %s334_s5 = scalar_lea.hbm %s1032_s2, %s519_s21  ;;  %s238_s24 = scalar_lea.vmem [#allocation7], %s508_s20 }
  0x32   : > { %v258_v5 = vld [vmem:[#allocation5 + $0x18] sm:$0xff]  ;;  %v257_v6 = vld [vmem:[#allocation5 + $0x10] sm:$0xff]  ;;  %v256_v7 = vld [vmem:[#allocation5 + $0x8] sm:$0xff]  ;;  %s335_s27 = sshll.u32 %s238_s24, 4  ;;  %s337_s28 = sshll.u32 %s334_s5, 4  ;;  %s947_s27 = int_to_ptr.vmem [resolvable:$true] %s335_s27  ;;  %s338_s28 = int_to_ptr.hbm [resolvable:$true] %s337_s28 }
  0x33   : > { %279 = vmatpush.msra.mxu0 %v262_v1  ;;  %521 = vmatpush.msra.mxu1 %v262_v1  ;;  %v255_v8 = vld [vmem:[#allocation5] sm:$0xff]  ;;  %v254_v10 = vld [vmem:[%s929_s7 + $0x8] sm:$0xff]  ;;  %s315_s6 = scalar_lea.sflag [#allocation4], %s923_s10  ;;  %s674_s11 = sshra.s32 %s338_s28, 4  ;;  %s675_s11 = int_to_ptr.hbm [resolvable:$true] %s674_s11 }
  0x34   : > { %v253_v9 = vld [vmem:[%s929_s7] sm:$0xff]  ;;  %s676_s13 = scalar_lea.hbm %s675_s11, 16  ;;  %s680_s23 = scalar_lea.hbm %s1032_s2, 32 }
  0x35   : > { %280 = vmatpush.msra.mxu0 %v261_v2  ;;  %522 = vmatpush.msra.mxu1 %v261_v2  ;;  %p677_p1 = scmp.ne.s32.totalorder %s675_s11, %s676_s13  ;;  %p681_p11 = scmp.lt.s32.totalorder %s675_s11, %s1032_s2 }
  0x36   : > { %p682_p9 = scmp.lt.s32.totalorder %s680_s23, %s676_s13 }
  0x37   : > { %281 = vmatpush.msra.mxu0 %v260_v3  ;;  %523 = vmatpush.msra.mxu1 %v260_v3  ;;  %p678_p4 = pnand %p677_p1, %p893_p3 }
  0x38   : > { %p683_p2 = por %p682_p9, %p681_p11 }
  0x39   : > { %282 = vmatpush.msra.mxu0 %v259_v4  ;;  %524 = vmatpush.msra.mxu1 %v259_v4  ;;  %p679_p8 = pneg %p678_p4 }
  0x3b   : > { %283 = vmatpush.msra.mxu0 %v258_v5  ;;  %525 = vmatpush.msra.mxu1 %v258_v5  ;;  %p684_p10 = pnand %p683_p2, %p679_p8 }
  0x3d   : > { %284 = vmatpush.msra.mxu0 %v257_v6  ;;  %526 = vmatpush.msra.mxu1 %v257_v6 }
  0x3f   : > { %285 = vmatpush.msra.mxu0 %v256_v7  ;;  %527 = vmatpush.msra.mxu1 %v256_v7 }
  0x41   : > { %286 = vmatpush.msra.mxu0 %v255_v8  ;;  %528 = vmatpush.msra.mxu1 %v255_v8 }
  0x42   : > { %511 = vmatmul.msk.f32.vlgmr.msra.gmra.mxu0 %vm264_vm0, %v253_v9  ;;  %512 = vmatmul.msk.f32.vlgmr.msra.gmra.mxu1 %vm264_vm0, %v254_v10 }
  0xbf   : > { %v288_v11 = vpop.f32.mrf.mxu0  ;;  %v291_v12 = vpop.f32.mrf.mxu1 }
  0xc0   : > { %294 = vst [vmem:[%s238_s24] sm:$0xff] %v288_v11  ;;  %v303_v13 = vmul.f32 %v288_v11, %v288_v11  ;;  %v296_v14 = vadd.f32 %v291_v12, %v288_v11  ;;  %v304_v15 = vmul.f32 %v291_v12, %v291_v12 }
  0xc1   : > { %295 = vst [vmem:[%s238_s24 + $0x8] sm:$0xff] %v291_v12 }
  0xc2   : > { %v297_v16 = vrot.slane %v296_v14, 4  ;;  %v305_v17 = vadd.f32 %v304_v15, %v303_v13 }
  0xc3   : > { %687 = shalt.err (!%p684_p10)
}
  0xc4   : > { %s795_s7 = smov 128   ;;  %s796_s21 = smov 8   ;;  %v298_v18 = vadd.f32 %v297_v16, %v296_v14  ;;  %v306_v19 = vrot.slane %v305_v17, 4 }
  0xc5   : > { %535 = dma.vmem_to_hbm [thread:$0]  (%p893_p3), %s947_s27, 256, %s338_s28, %s315_s6, %s795_s7, %s795_s7, %s796_s21  }
  0xc6   : > { %v299_v20 = vrot.slane %v298_v18, 2  ;;  %v307_v21 = vadd.f32 %v306_v19, %v305_v17  ;;  %s349_s5 = scalar_lea.hbm %s1033_s3, %s843_s19  ;;  %s319_s24 = sand.u32 1, %s843_s19  }
  0xc7   : > { %s362_s12 = scalar_lea.hbm %s1034_s4, %s843_s19  ;;  %s244_s14 = scalar_lea.vmem [#allocation8], %s923_s10 }
  0xc8   : > { %v300_v22 = vadd.f32 %v299_v20, %v298_v18  ;;  %v308_v23 = vrot.slane %v307_v21, 2  ;;  %s971_s23 = sshll.u32 %s244_s14, 4  ;;  %s973_s27 = sshll.u32 %s349_s5, 4  ;;  %s352_s23 = int_to_ptr.vmem [resolvable:$true] %s971_s23  ;;  %s354_s27 = int_to_ptr.hbm [resolvable:$true] %s973_s27 }
  0xc9   : > { %s250_s28 = scalar_lea.vmem [#allocation10], %s923_s10  ;;  %s978_s20 = sshll.u32 %s362_s12, 4  ;;  %s367_s20 = int_to_ptr.hbm [resolvable:$true] %s978_s20 }
  0xca   : > { %v301_v24 = vrot.slane %v300_v22, 1  ;;  %v309_v25 = vadd.f32 %v308_v23, %v307_v21  ;;  %s976_s6 = sshll.u32 %s250_s28, 4  ;;  %s320_s19 = scalar_lea.sflag [#allocation9], %s319_s24  ;;  %s365_s6 = int_to_ptr.vmem [resolvable:$true] %s976_s6 }
  0xcb   : > { %s702_s25 = sshra.s32 %s354_s27, 4  ;;  %s708_s26 = scalar_lea.hbm %s1033_s3, 2  ;;  %s703_s25 = int_to_ptr.hbm [resolvable:$true] %s702_s25 }
  0xcc   : > { %v302_v26 = vadd.f32 %v301_v24, %v300_v22  ;;  %v310_v27 = vrot.slane %v309_v25, 1  ;;  %s704_s7 = scalar_lea.hbm %s703_s25, 1  ;;  %p709_p5 = scmp.lt.s32.totalorder %s703_s25, %s1033_s3 }
  0xcd   : > { %p705_p12 = scmp.ne.s32.totalorder %s703_s25, %s704_s7  ;;  %p710_p7 = scmp.lt.s32.totalorder %s708_s26, %s704_s7 }
  0xce   : > { %v311_v28 = vadd.f32 %v310_v27, %v309_v25  ;;  %312 = vst [vmem:[%s244_s14] sm:$0x1] %v302_v26 }
  0xcf   : > { %p706_p13 = pnand %p705_p12, %p893_p3  ;;  %p711_p1 = por %p710_p7, %p709_p5 }
  0xd1   : > { %p707_p0 = pneg %p706_p13 }
  0xd3   : > { %p712_p4 = pnand %p711_p1, %p707_p0 }
  0xd5   : > { %715 = shalt.err (!%p712_p4)
}
  0xd6   : > { %536 = dma.vmem_to_hbm [thread:$0]  (%p893_p3), %s352_s23, 16, %s354_s27, %s320_s19   ;;  %313 = vst [vmem:[%s250_s28] sm:$0x1] %v311_v28 }
  0xd7   : > { %s730_s24 = sshra.s32 %s367_s20, 4  ;;  %s736_s14 = scalar_lea.hbm %s1034_s4, 2  ;;  %s731_s24 = int_to_ptr.hbm [resolvable:$true] %s730_s24 }
  0xd8   : > { %s732_s11 = scalar_lea.hbm %s731_s24, 1  ;;  %p737_p2 = scmp.lt.s32.totalorder %s731_s24, %s1034_s4 }
  0xd9   : > { %p733_p8 = scmp.ne.s32.totalorder %s731_s24, %s732_s11  ;;  %p738_p10 = scmp.lt.s32.totalorder %s736_s14, %s732_s11 }
  0xdb   : > { %p734_p11 = pnand %p733_p8, %p893_p3  ;;  %p739_p12 = por %p738_p10, %p737_p2 }
  0xdd   : > { %p735_p9 = pneg %p734_p11 }
  0xdf   : > { %p740_p13 = pnand %p739_p12, %p735_p9 }
  0xe1   : > { %743 = shalt.err (!%p740_p13)
}
  0xe2   : > { %537 = dma.vmem_to_hbm [thread:$0]  (%p893_p3), %s365_s6, 16, %s367_s20, %s320_s19  }
  0xe3 PF: > { %s378_s23 = sand.u32 1, %s778_s15   ;;  %p1041_p0 = scmp.ge.s32.totalorder %s790_s18, 2 }
  0xe4   : > { %s379_s27 = scalar_lea.sflag [#allocation4], %s378_s23 }
  0xe5   : > { %p550_p5 = pnand %p1041_p0, %p859_p6 }
  0xe7   : > { %p551_p7 = pneg %p550_p5 }
  0xe9   : > { %769 = dma.done.wait (%p551_p7), %s379_s27, 256  }
  0xea   : > { %771 = vsyncadd (%p551_p7), %s379_s27, 4294967040  ;;  %s1042_s28 = sadd.s32 4294967294, %s790_s18  }
  0xeb   : > { %s388_s9 = sand.u32 1, %s1042_s28  }
  0xec   : > { %s389_s10 = scalar_lea.sflag [#allocation9], %s388_s9 }
  0xed   : > { %773 = dma.done.wait (%p551_p7), %s389_s10, 32  }
  0xee   : > { %775 = vsyncadd (%p551_p7), %s389_s10, 4294967264  ;;  %p22_p3 = scmp.ge.s32.totalorder %s877_s29, 4   ;;  %s1043_s15 = smov %s782_s16 }
  0xef   : > { %s1044_s16 = smov %s786_s17  ;;  %s1045_s17 = smov %s889_s8 }
  0xf0   : > { %s1046_s18 = smov %s877_s29  ;;  %24 = sbr.rel (!%p22_p3) target bundleno = 8 (0x8), region = 109 }
  0xf5   :  { %403 = vsyncpa [#allocation3], 1 }
  0xf6   :  { %405 = vsyncpa [#allocation3 + $0x1], 1 }
  0xf7   :  { %406 = vsyncpa [#allocation6], 1 }
  0xf8   :  { %407 = vsyncpa [#allocation4], 1 }
  0xf9   :  { %409 = vsyncpa [#allocation4 + $0x1], 1 }
  0xfa   :  { %410 = vsyncpa [#allocation9], 1 }
  0xfb   :  { %412 = vsyncpa [#allocation9 + $0x1], 1 }

// kernel: tpu_custom_call.1
= control target key start
LH: loop header
LB: loop body
LE: loop exit
PB: predicated region body
PF: predicated region fallthrough
CT: control target
= control target key end

     0   :  { %10 = vsyncpa [#allocation3], 0  ;;  %s1030_s0 = inlined_call_operand.hbm [shape: f32[32,72], index: 0, kind: input, shape index: {}]   ;;  %s1031_s1 = inlined_call_operand.hbm [shape: f32[72,128], index: 1, kind: input, shape index: {}]   ;;  %s1032_s2 = inlined_call_operand.hbm [shape: f32[32,128], index: 2, kind: output, shape index: {0}]   ;;  %s1033_s3 = inlined_call_operand.hbm [shape: f32[2,1,128], index: 3, kind: output, shape index: {1}]   ;;  %s1034_s4 = inlined_call_operand.hbm [shape: f32[2,1,128], index: 4, kind: output, shape index: {2}]  }
   0x1   :  { %12 = vsyncpa [#allocation3 + $0x1], 0 }
   0x2   :  { %13 = vsyncpa [#allocation6], 0 }
   0x3   :  { %14 = vsyncpa [#allocation4], 0 }
   0x4   :  { %16 = vsyncpa [#allocation4 + $0x1], 0 }
   0x5   :  { %17 = vsyncpa [#allocation9], 0 }
   0x6   :  { %19 = vsyncpa [#allocation9 + $0x1], 0  ;;  %s822_s15 = smov 0   ;;  %s824_s16 = smov 0  }
   0x7   :  { %s826_s17 = smov 0   ;;  %s828_s18 = smov 0  }
   0x8 LB: > { %s843_s19 = sadd.s32 4294967295, %s790_s18   ;;  %s1035_s20 = sadd.s32 4294967294, %s790_s18   ;;  %s790_s18 = sphi %s828_s18, %s1046_s18   ;;  %s786_s17 = sphi %s826_s17, %s1045_s17   ;;  %s782_s16 = sphi %s824_s16, %s1044_s16   ;;  %s778_s15 = sphi %s822_s15, %s1043_s15  }
   0x9   : > { %p45_p0 = scmp.ne.s32.totalorder %s782_s16, %s778_s15  ;;  %p46_p1 = scmp.eq.s32.totalorder %s843_s19, 0 }
   0xa   : > { %p90_p2 = scmp.eq.s32.totalorder %s843_s19, 1  ;;  %p96_p3 = scmp.eq.s32.totalorder %s1035_s20, 1 }
   0xb   : > { %p854_p4 = por %p46_p1, %p45_p0  ;;  %p501_p5 = scmp.ge.s32.totalorder %s790_s18, 1 }
   0xc   : > { %p859_p6 = por %p96_p3, %p45_p0  ;;  %p155_p7 = scmp.lt.s32.totalorder %s790_s18, 3 }
   0xd   : > { %s166_s25 = sshll.u32 %s1031_s1, 4  ;;  %s792_s27 = smov [#allocation5]   ;;  %s167_s25 = int_to_ptr.hbm [resolvable:$true] %s166_s25 }
   0xe   : > { %p867_p8 = pnand %p501_p5, %p155_p7  ;;  %s168_s28 = sshll.u32 %s792_s27, 4  ;;  %s169_s28 = int_to_ptr.vmem [resolvable:$true] %s168_s28 }
   0xf   : > { %s877_s29 = sadd.s32 1, %s790_s18   ;;  %s793_s30 = smov 128  }
  0x10   : > { %p541_p9 = pneg %p867_p8  ;;  %s794_s5 = smov 8  }
  0x11   : > { %s29_s6 = ssub.s32 %s790_s18, %s877_s29  ;;  %s32_s7 = sadd.s32 1, %s786_s17 }
  0x12   : > { %p542_p10 = pnand %p541_p9, %p46_p1  ;;  %p30_p12 = scmp.eq.s32.totalorder %s29_s6, 0 }
  0x13   : > { %p39_p13 = scmp.ne.s32.totalorder %s786_s17, %s782_s16  ;;  %p40_p0 = scmp.eq.s32.totalorder %s790_s18, 0 }
  0x14   : > { %544 = dma.hbm_to_vmem [thread:$0]  (!%p542_p10), %s167_s25, 1152, %s169_s28, [#allocation6], %s793_s30, %s793_s30, %s794_s5  }
  0x15   : > { %s889_s8 = scalar_select %p30_p12, %s786_s17, %s32_s7  }
  0x16   : > { %p893_p3 = por %p90_p2, %p39_p13  ;;  %p560_p5 = scmp.lt.s32.totalorder %s790_s18, 2 }
  0x17   : > { %s182_s10 = sand.u32 1, %s786_s17   ;;  %s518_s11 = sshll.u32 %s790_s18, 4 }
  0x18   : > { %p41_p7 = por %p40_p0, %p39_p13  ;;  %s504_s12 = sshll.u32 %s182_s10, 4 }
  0x19   : > { %s191_s23 = scalar_lea.hbm %s1030_s0, %s518_s11  ;;  %s186_s25 = scalar_lea.vmem [#allocation2], %s504_s12 }
  0x1a   : > { %s192_s24 = sshll.u32 %s191_s23, 4  ;;  %s194_s27 = sshll.u32 %s186_s25, 4  ;;  %s193_s24 = int_to_ptr.hbm [resolvable:$true] %s192_s24  ;;  %s195_s27 = int_to_ptr.vmem [resolvable:$true] %s194_s27 }
  0x1b   : > { %p903_p9 = pnand %p560_p5, %p41_p7  ;;  %s183_s6 = scalar_lea.sflag [#allocation3], %s182_s10 }
  0x1c   : > { %s630_s7 = sshra.s32 %s193_s24, 4  ;;  %s637_s12 = scalar_lea.hbm %s1030_s0, 32  ;;  %s631_s7 = int_to_ptr.hbm [resolvable:$true] %s630_s7 }
  0x1d   : > { %s632_s20 = scalar_lea.hbm %s631_s7, 16  ;;  %p634_p10 = pneg %p903_p9 }
  0x1e   : > { %p633_p2 = scmp.ne.s32.totalorder %s631_s7, %s632_s20  ;;  %p638_p0 = scmp.lt.s32.totalorder %s631_s7, %s1030_s0 }
  0x1f   : > { %p639_p5 = scmp.lt.s32.totalorder %s637_s12, %s632_s20 }
  0x20   : > { %p635_p12 = pnand %p634_p10, %p633_p2 }
  0x21   : > { %p640_p7 = por %p639_p5, %p638_p0 }
  0x22   : > { %p636_p13 = pneg %p635_p12 }
  0x24   : > { %p641_p11 = pnand %p640_p7, %p636_p13 }
  0x26   : > { %644 = shalt.err (!%p641_p11)
}
  0x27   : > { %548 = dma.hbm_to_vmem [thread:$0]  (!%p903_p9), %s193_s24, 256, %s195_s27, %s183_s6, %s793_s30, %s793_s30, %s794_s5  }
  0x28   : > { %206 = sbr.rel (%p867_p8) target bundleno = 227 (0xe3), region = 28  ;;  %s923_s10 = sand.u32 (!%p867_p8), 1, %s782_s16  }
  0x29   : > { %s508_s20 = sshll.u32 (!%p867_p8), %s923_s10, 4  ;;  %s209_s25 = scalar_lea.sflag (!%p867_p8), [#allocation3], %s923_s10 }
  0x2a   : > { %s929_s7 = scalar_lea.vmem (!%p867_p8), [#allocation2], %s508_s20 }
  0x2d   : > { %761 = dma.done.wait (%p854_p4), %s209_s25, 256  }
  0x2e   : > { %763 = vsyncadd (%p854_p4), %s209_s25, 4294967040 }
  0x2f   : > { %765 = dma.done.wait (%p46_p1), [#allocation6], 1152  }
  0x30   : > { %767 = vsyncadd (%p46_p1), [#allocation6], 4294966144  ;;  %v263_v0 = vld [vmem:[#allocation5 + $0x40] sm:$0xff]  ;;  %v262_v1 = vld [vmem:[#allocation5 + $0x38] sm:$0xff]  ;;  %vm264_vm0 = vcmask 588800   ;;  %s519_s21 = sshll.u32 %s843_s19, 4 }
  0x31   : > { %278 = vmatpush.msra.mxu0 %v263_v0  ;;  %520 = vmatpush.msra.mxu1 %v263_v0  ;;  %v261_v2 = vld [vmem:[#allocation5 + $0x30] sm:$0xff]  ;;  %v260_v3 = vld [vmem:[#allocation5 + $0x28] sm:$0xff]  ;;  %v259_v4 = vld [vmem:[#allocation5 + $0x20] sm:$0xff]  ;;  %s334_s5 = scalar_lea.hbm %s1032_s2, %s519_s21  ;;  %s238_s24 = scalar_lea.vmem [#allocation7], %s508_s20 }
  0x32   : > { %v258_v5 = vld [vmem:[#allocation5 + $0x18] sm:$0xff]  ;;  %v257_v6 = vld [vmem:[#allocation5 + $0x10] sm:$0xff]  ;;  %v256_v7 = vld [vmem:[#allocation5 + $0x8] sm:$0xff]  ;;  %s335_s27 = sshll.u32 %s238_s24, 4  ;;  %s337_s28 = sshll.u32 %s334_s5, 4  ;;  %s947_s27 = int_to_ptr.vmem [resolvable:$true] %s335_s27  ;;  %s338_s28 = int_to_ptr.hbm [resolvable:$true] %s337_s28 }
  0x33   : > { %279 = vmatpush.msra.mxu0 %v262_v1  ;;  %521 = vmatpush.msra.mxu1 %v262_v1  ;;  %v255_v8 = vld [vmem:[#allocation5] sm:$0xff]  ;;  %v254_v10 = vld [vmem:[%s929_s7 + $0x8] sm:$0xff]  ;;  %s315_s6 = scalar_lea.sflag [#allocation4], %s923_s10  ;;  %s674_s11 = sshra.s32 %s338_s28, 4  ;;  %s675_s11 = int_to_ptr.hbm [resolvable:$true] %s674_s11 }
  0x34   : > { %v253_v9 = vld [vmem:[%s929_s7] sm:$0xff]  ;;  %s676_s13 = scalar_lea.hbm %s675_s11, 16  ;;  %s680_s23 = scalar_lea.hbm %s1032_s2, 32 }
  0x35   : > { %280 = vmatpush.msra.mxu0 %v261_v2  ;;  %522 = vmatpush.msra.mxu1 %v261_v2  ;;  %p677_p1 = scmp.ne.s32.totalorder %s675_s11, %s676_s13  ;;  %p681_p11 = scmp.lt.s32.totalorder %s675_s11, %s1032_s2 }
  0x36   : > { %p682_p9 = scmp.lt.s32.totalorder %s680_s23, %s676_s13 }
  0x37   : > { %281 = vmatpush.msra.mxu0 %v260_v3  ;;  %523 = vmatpush.msra.mxu1 %v260_v3  ;;  %p678_p4 = pnand %p677_p1, %p893_p3 }
  0x38   : > { %p683_p2 = por %p682_p9, %p681_p11 }
  0x39   : > { %282 = vmatpush.msra.mxu0 %v259_v4  ;;  %524 = vmatpush.msra.mxu1 %v259_v4  ;;  %p679_p8 = pneg %p678_p4 }
  0x3b   : > { %283 = vmatpush.msra.mxu0 %v258_v5  ;;  %525 = vmatpush.msra.mxu1 %v258_v5  ;;  %p684_p10 = pnand %p683_p2, %p679_p8 }
  0x3d   : > { %284 = vmatpush.msra.mxu0 %v257_v6  ;;  %526 = vmatpush.msra.mxu1 %v257_v6 }
  0x3f   : > { %285 = vmatpush.msra.mxu0 %v256_v7  ;;  %527 = vmatpush.msra.mxu1 %v256_v7 }
  0x41   : > { %286 = vmatpush.msra.mxu0 %v255_v8  ;;  %528 = vmatpush.msra.mxu1 %v255_v8 }
  0x42   : > { %511 = vmatmul.msk.f32.vlgmr.msra.gmra.mxu0 %vm264_vm0, %v253_v9  ;;  %512 = vmatmul.msk.f32.vlgmr.msra.gmra.mxu1 %vm264_vm0, %v254_v10 }
  0xbf   : > { %v288_v11 = vpop.f32.mrf.mxu0  ;;  %v291_v12 = vpop.f32.mrf.mxu1 }
  0xc0   : > { %294 = vst [vmem:[%s238_s24] sm:$0xff] %v288_v11  ;;  %v303_v13 = vmul.f32 %v288_v11, %v288_v11  ;;  %v296_v14 = vadd.f32 %v291_v12, %v288_v11  ;;  %v304_v15 = vmul.f32 %v291_v12, %v291_v12 }
  0xc1   : > { %295 = vst [vmem:[%s238_s24 + $0x8] sm:$0xff] %v291_v12 }
  0xc2   : > { %v297_v16 = vrot.slane %v296_v14, 4  ;;  %v305_v17 = vadd.f32 %v304_v15, %v303_v13 }
  0xc3   : > { %687 = shalt.err (!%p684_p10)
}
  0xc4   : > { %s795_s7 = smov 128   ;;  %s796_s21 = smov 8   ;;  %v298_v18 = vadd.f32 %v297_v16, %v296_v14  ;;  %v306_v19 = vrot.slane %v305_v17, 4 }
  0xc5   : > { %535 = dma.vmem_to_hbm [thread:$0]  (%p893_p3), %s947_s27, 256, %s338_s28, %s315_s6, %s795_s7, %s795_s7, %s796_s21  }
  0xc6   : > { %v299_v20 = vrot.slane %v298_v18, 2  ;;  %v307_v21 = vadd.f32 %v306_v19, %v305_v17  ;;  %s349_s5 = scalar_lea.hbm %s1033_s3, %s843_s19  ;;  %s319_s24 = sand.u32 1, %s843_s19  }
  0xc7   : > { %s362_s12 = scalar_lea.hbm %s1034_s4, %s843_s19  ;;  %s244_s14 = scalar_lea.vmem [#allocation8], %s923_s10 }
  0xc8   : > { %v300_v22 = vadd.f32 %v299_v20, %v298_v18  ;;  %v308_v23 = vrot.slane %v307_v21, 2  ;;  %s971_s23 = sshll.u32 %s244_s14, 4  ;;  %s973_s27 = sshll.u32 %s349_s5, 4  ;;  %s352_s23 = int_to_ptr.vmem [resolvable:$true] %s971_s23  ;;  %s354_s27 = int_to_ptr.hbm [resolvable:$true] %s973_s27 }
  0xc9   : > { %s250_s28 = scalar_lea.vmem [#allocation10], %s923_s10  ;;  %s978_s20 = sshll.u32 %s362_s12, 4  ;;  %s367_s20 = int_to_ptr.hbm [resolvable:$true] %s978_s20 }
  0xca   : > { %v301_v24 = vrot.slane %v300_v22, 1  ;;  %v309_v25 = vadd.f32 %v308_v23, %v307_v21  ;;  %s976_s6 = sshll.u32 %s250_s28, 4  ;;  %s320_s19 = scalar_lea.sflag [#allocation9], %s319_s24  ;;  %s365_s6 = int_to_ptr.vmem [resolvable:$true] %s976_s6 }
  0xcb   : > { %s702_s25 = sshra.s32 %s354_s27, 4  ;;  %s708_s26 = scalar_lea.hbm %s1033_s3, 2  ;;  %s703_s25 = int_to_ptr.hbm [resolvable:$true] %s702_s25 }
  0xcc   : > { %v302_v26 = vadd.f32 %v301_v24, %v300_v22  ;;  %v310_v27 = vrot.slane %v309_v25, 1  ;;  %s704_s7 = scalar_lea.hbm %s703_s25, 1  ;;  %p709_p5 = scmp.lt.s32.totalorder %s703_s25, %s1033_s3 }
  0xcd   : > { %p705_p12 = scmp.ne.s32.totalorder %s703_s25, %s704_s7  ;;  %p710_p7 = scmp.lt.s32.totalorder %s708_s26, %s704_s7 }
  0xce   : > { %v311_v28 = vadd.f32 %v310_v27, %v309_v25  ;;  %312 = vst [vmem:[%s244_s14] sm:$0x1] %v302_v26 }
  0xcf   : > { %p706_p13 = pnand %p705_p12, %p893_p3  ;;  %p711_p1 = por %p710_p7, %p709_p5 }
  0xd1   : > { %p707_p0 = pneg %p706_p13 }
  0xd3   : > { %p712_p4 = pnand %p711_p1, %p707_p0 }
  0xd5   : > { %715 = shalt.err (!%p712_p4)
}
  0xd6   : > { %536 = dma.vmem_to_hbm [thread:$0]  (%p893_p3), %s352_s23, 16, %s354_s27, %s320_s19   ;;  %313 = vst [vmem:[%s250_s28] sm:$0x1] %v311_v28 }
  0xd7   : > { %s730_s24 = sshra.s32 %s367_s20, 4  ;;  %s736_s14 = scalar_lea.hbm %s1034_s4, 2  ;;  %s731_s24 = int_to_ptr.hbm [resolvable:$true] %s730_s24 }
  0xd8   : > { %s732_s11 = scalar_lea.hbm %s731_s24, 1  ;;  %p737_p2 = scmp.lt.s32.totalorder %s731_s24, %s1034_s4 }
  0xd9   : > { %p733_p8 = scmp.ne.s32.totalorder %s731_s24, %s732_s11  ;;  %p738_p10 = scmp.lt.s32.totalorder %s736_s14, %s732_s11 }
  0xdb   : > { %p734_p11 = pnand %p733_p8, %p893_p3  ;;  %p739_p12 = por %p738_p10, %p737_p2 }
  0xdd   : > { %p735_p9 = pneg %p734_p11 }
  0xdf   : > { %p740_p13 = pnand %p739_p12, %p735_p9 }
  0xe1   : > { %743 = shalt.err (!%p740_p13)
}
  0xe2   : > { %537 = dma.vmem_to_hbm [thread:$0]  (%p893_p3), %s365_s6, 16, %s367_s20, %s320_s19  }
  0xe3 PF: > { %s378_s23 = sand.u32 1, %s778_s15   ;;  %p1041_p0 = scmp.ge.s32.totalorder %s790_s18, 2 }
  0xe4   : > { %s379_s27 = scalar_lea.sflag [#allocation4], %s378_s23 }
  0xe5   : > { %p550_p5 = pnand %p1041_p0, %p859_p6 }
  0xe7   : > { %p551_p7 = pneg %p550_p5 }
  0xe9   : > { %769 = dma.done.wait (%p551_p7), %s379_s27, 256  }
  0xea   : > { %771 = vsyncadd (%p551_p7), %s379_s27, 4294967040  ;;  %s1042_s28 = sadd.s32 4294967294, %s790_s18  }
  0xeb   : > { %s388_s9 = sand.u32 1, %s1042_s28  }
  0xec   : > { %s389_s10 = scalar_lea.sflag [#allocation9], %s388_s9 }
  0xed   : > { %773 = dma.done.wait (%p551_p7), %s389_s10, 32  }
  0xee   : > { %775 = vsyncadd (%p551_p7), %s389_s10, 4294967264  ;;  %p22_p3 = scmp.ge.s32.totalorder %s877_s29, 4   ;;  %s1043_s15 = smov %s782_s16 }
  0xef   : > { %s1044_s16 = smov %s786_s17  ;;  %s1045_s17 = smov %s889_s8 }
  0xf0   : > { %s1046_s18 = smov %s877_s29  ;;  %24 = sbr.rel (!%p22_p3) target bundleno = 8 (0x8), region = 109 }
  0xf5   :  { %403 = vsyncpa [#allocation3], 1 }
  0xf6   :  { %405 = vsyncpa [#allocation3 + $0x1], 1 }
  0xf7   :  { %406 = vsyncpa [#allocation6], 1 }
  0xf8   :  { %407 = vsyncpa [#allocation4], 1 }
  0xf9   :  { %409 = vsyncpa [#allocation4 + $0x1], 1 }
  0xfa   :  { %410 = vsyncpa [#allocation9], 1 }
  0xfb   :  { %412 = vsyncpa [#allocation9 + $0x1], 1 }

</bundles_post_ra>
